<compile_context>
chip_gen: v5e
topology: v5e:2x2
jax: 0.10.0
libtpu: 0.0.40
codegen_flags: <defaults>
</compile_context>

<pallas_src>
import numpy as np
import jax
import jax.numpy as jnp
from jax import lax
from jax.experimental import pallas as pl
from jax.experimental.pallas import tpu as pltpu


def _round_up(x, m):
    return ((x + m - 1) // m) * m


def _make_colsum_kernel(recons_type: str, row_tile: int, n_rows: int,
                        num_blocks: int, sanitize: bool):
    """Per-block kernel: writes column sums of the per-element error."""
    needs_mask = (n_rows % row_tile) != 0
    rows_last = n_rows - (num_blocks - 1) * row_tile  # valid rows in last tile

    def kernel(gt_ref, pr_ref, out_ref):
        g = gt_ref[...].astype(jnp.float32)
        p = pr_ref[...].astype(jnp.float32)

        if sanitize:
            # torch.nan_to_num semantics: NaN -> 0, +-Inf -> finite extremes.
            big = jnp.float32(jnp.finfo(jnp.float32).max)
            g = jnp.clip(jnp.where(g != g, jnp.float32(0.0), g), -big, big)
            p = jnp.clip(jnp.where(p != p, jnp.float32(0.0), p), -big, big)

        d = g - p
        if recons_type == "l2":
            per_elem = d * d
        elif recons_type == "l1":
            per_elem = jnp.abs(d)
        elif recons_type == "l1_smooth":
            ad = jnp.abs(d)
            per_elem = jnp.where(ad < 1.0, 0.5 * d * d, ad - 0.5)
        else:
            raise NotImplementedError(recons_type)

        # Lane-dense [1, D] partial; single sublane-axis reduction per tile.
        out_ref[...] = jnp.sum(per_elem, axis=0, keepdims=True)[None]

        if needs_mask:
            # Only the last tile has rows past the end of the real array
            # (OOB / stale VMEM rows read by the block DMA).  Re-reduce with
            # a mask and overwrite — runs at runtime only on the last step.
            @pl.when(pl.program_id(0) == num_blocks - 1)
            def _():
                row = lax.broadcasted_iota(
                    jnp.int32, (per_elem.shape[0], 1), 0)
                masked = jnp.where(row < rows_last, per_elem,
                                   jnp.float32(0.0))
                out_ref[...] = jnp.sum(masked, axis=0, keepdims=True)[None]

    return kernel


def _column_error_sums(gt2, pr2, recons_type="l2", row_tile=2048,
                       sanitize=False):
    """gt2/pr2: [R, D]. Returns f32[D]: per-column sum of elementwise error."""
    R, D = gt2.shape

    # Sublane-aligned tile, never (much) larger than the row count.
    row_tile = max(8, _round_up(int(row_tile), 8))
    row_tile = min(row_tile, _round_up(R, 8))
    num_blocks = int(pl.cdiv(R, row_tile))

    kernel = _make_colsum_kernel(recons_type, row_tile, R, num_blocks,
                                 sanitize)

    elem_bytes = jnp.dtype(gt2.dtype).itemsize + jnp.dtype(pr2.dtype).itemsize
    block_bytes = row_tile * D * elem_bytes
    # 2 pipeline buffers per input + headroom; capped under v7x's 64 MiB.
    vmem_limit = int(min(max(4 * block_bytes + (2 << 20), 16 << 20), 48 << 20))

    in_bytes = R * D * elem_bytes
    cost = pl.CostEstimate(flops=3 * R * D, transcendentals=0,
                           bytes_accessed=in_bytes + num_blocks * D * 4)

    partials = pl.pallas_call(
        kernel,
        out_shape=jax.ShapeDtypeStruct((num_blocks, 1, D), jnp.float32),
        grid_spec=pltpu.PrefetchScalarGridSpec(
            num_scalar_prefetch=0,
            grid=(num_blocks,),
            in_specs=[
                pl.BlockSpec((row_tile, D), lambda i: (i, 0)),
                pl.BlockSpec((row_tile, D), lambda i: (i, 0)),
            ],
            out_specs=pl.BlockSpec((1, 1, D), lambda i: (i, 0, 0)),
        ),
        compiler_params=pltpu.CompilerParams(
            dimension_semantics=("parallel",),
            vmem_limit_bytes=vmem_limit,
        ),
        cost_estimate=cost,
    )(gt2, pr2)

    return jnp.sum(partials, axis=(0, 1))  # f32[D]


def joints_whole_body_loss(
    inputs,
    outputs,
    *,
    recons_type="l2",
    nb_joints=52,
    pos_body=1.5,
    pos_hand=1.5,
    root=1.0,
    commit=0.02,
    rot_hand=0.0,
    rot_body=0.0,
    row_tile=2048,
):
    """JAX/Pallas port of JointsWholeBodyLoss.forward."""
    gt = inputs["motion"]
    recons = outputs["pred_motion"]

    D = gt.shape[-1]
    R = int(np.prod(gt.shape[:-1]))

    colsum = _column_error_sums(gt.reshape(R, D), recons.reshape(R, D),
                                recons_type=recons_type, row_tile=row_tile)

    # Column counts per slice derived from the actual feature dim so the
    # mean divisors always match the summed columns (handles D != 156).
    c_root = min(3, D)
    c_body = max(0, min(66, D) - 3)
    c_hand = max(0, min(156, D) - 66)

    s_root = jnp.sum(colsum[:3])
    s_body = jnp.sum(colsum[3:66])
    s_hand = jnp.sum(colsum[66:156])

    rf = float(R)
    loss_dict = {
        "transl_loss": root * (s_root / (rf * max(c_root, 1))),
        "pos_body_loss": pos_body * (s_body / (rf * max(c_body, 1))),
        "pos_hand_loss": pos_hand * (s_hand / (rf * max(c_hand, 1))),
        "commit_loss": commit * outputs["commit_loss"],
    }

    if rot_body or rot_hand:
        gt_rot = outputs["gt_rotation"]
        pr_rot = outputs["pred_rotation"]
        J, C = gt_rot.shape[-2], gt_rot.shape[-1]
        Rr = int(np.prod(gt_rot.shape[:-2]))
        Dr = J * C
        rot_colsum = _column_error_sums(
            gt_rot.reshape(Rr, Dr), pr_rot.reshape(Rr, Dr),
            recons_type=recons_type, row_tile=row_tile, sanitize=True)
        split = min(22 * C, Dr)
        c_rb = split
        c_rh = Dr - split
        rrf = float(Rr)
        loss_dict["rot_body_loss"] = rot_body * (
            jnp.sum(rot_colsum[:split]) / (rrf * max(c_rb, 1)))
        loss_dict["rot_hand_loss"] = rot_hand * (
            jnp.sum(rot_colsum[split:]) / (rrf * max(c_rh, 1)))

    return loss_dict


if __name__ == "__main__":
    key = jax.random.PRNGKey(0)
    k1, k2, k3 = jax.random.split(key, 3)

    def mse(a, b):
        return jnp.mean((a - b) ** 2)

    def l1s(a, b):
        d = a - b
        ad = jnp.abs(d)
        return jnp.mean(jnp.where(ad < 1.0, 0.5 * d * d, ad - 0.5))

    def check(B, T, recons_type, ref_fn):
        D = 156  # nb_joints * 3
        ka, kb = jax.random.split(jax.random.fold_in(k1, B * 100 + T), 2)
        gt = jax.random.normal(ka, (B, T, D), dtype=jnp.float32)
        pred = gt + 0.1 * jax.random.normal(kb, (B, T, D), dtype=jnp.float32)
        commit_loss = jnp.abs(jax.random.normal(k3, (), dtype=jnp.float32))

        inputs = {"motion": gt}
        outputs = {"pred_motion": pred, "commit_loss": commit_loss}

        losses = joints_whole_body_loss(inputs, outputs,
                                        recons_type=recons_type)
        losses = jax.tree_util.tree_map(jax.block_until_ready, losses)

        ref = {
            "transl_loss": 1.0 * ref_fn(gt[..., :3], pred[..., :3]),
            "pos_body_loss": 1.5 * ref_fn(gt[..., 3:66], pred[..., 3:66]),
            "pos_hand_loss": 1.5 * ref_fn(gt[..., 66:156], pred[..., 66:156]),
            "commit_loss": 0.02 * commit_loss,
        }
        for name in ref:
            np.testing.assert_allclose(
                np.asarray(losses[name]), np.asarray(ref[name]),
                rtol=1e-5, atol=1e-6)

    def check_rot(B, T):
        D = 156
        ka, kb, kc, kd = jax.random.split(jax.random.fold_in(k2, B + T), 4)
        gt = jax.random.normal(ka, (B, T, D), dtype=jnp.float32)
        pred = gt + 0.1 * jax.random.normal(kb, (B, T, D), dtype=jnp.float32)
        gt_rot = jax.random.normal(kc, (B, T, 52, 3), dtype=jnp.float32)
        pr_rot = gt_rot + 0.1 * jax.random.normal(kd, (B, T, 52, 3),
                                                  dtype=jnp.float32)
        # Inject NaNs to exercise the in-kernel nan_to_num path.
        gt_rot = gt_rot.at[0, 0, 0, 0].set(jnp.nan)
        pr_rot = pr_rot.at[0, 1, 5, 2].set(jnp.nan)
        commit_loss = jnp.abs(jax.random.normal(k3, (), dtype=jnp.float32))

        inputs = {"motion": gt}
        outputs = {"pred_motion": pred, "commit_loss": commit_loss,
                   "gt_rotation": gt_rot, "pred_rotation": pr_rot}

        losses = joints_whole_body_loss(inputs, outputs, recons_type="l2",
                                        rot_body=1.0, rot_hand=0.5)
        losses = jax.tree_util.tree_map(jax.block_until_ready, losses)

        g_s = jnp.nan_to_num(gt_rot)
        p_s = jnp.nan_to_num(pr_rot)
        ref_rb = 1.0 * mse(g_s[..., :22, :], p_s[..., :22, :])
        ref_rh = 0.5 * mse(g_s[..., 22:, :], p_s[..., 22:, :])
        np.testing.assert_allclose(np.asarray(losses["rot_body_loss"]),
                                   np.asarray(ref_rb), rtol=1e-5, atol=1e-6)
        np.testing.assert_allclose(np.asarray(losses["rot_hand_loss"]),
                                   np.asarray(ref_rh), rtol=1e-5, atol=1e-6)

    # Divisible row count (B*T multiple of 8) -> no masking at runtime.
    check(B=2, T=8, recons_type="l2", ref_fn=mse)
    # Ragged row count (B*T = 21) -> exercises the last-tile masking path.
    check(B=3, T=7, recons_type="l2", ref_fn=mse)
    # Alternative reconstruction type for coverage.
    check(B=2, T=8, recons_type="l1_smooth", ref_fn=l1s)
    # Rotation-loss branch (nan_to_num + [..., :22, :] / [..., 22:, :] split).
    check_rot(B=2, T=8)

    print("KERNEL_OK")
</pallas_src>

<mosaic_0001>
module attributes {stable_mosaic.version = 11 : i64} {
  func.func @kernel(%arg0: i32, %arg1: memref<16x156xf32, #tpu.memory_space<vmem>>, %arg2: memref<16x156xf32, #tpu.memory_space<vmem>>, %arg3: memref<1x1x156xf32, #tpu.memory_space<vmem>>) attributes {dimension_semantics = [#tpu.dimension_semantics<parallel>], iteration_bounds = array<i64: 1>, scalar_prefetch = 0 : i64, scratch_operands = 0 : i64, tpu.core_type = #tpu.core_type<tc>, window_params = [{transform_indices = @transform_0, window_bounds = array<i64: 16, 156>}, {transform_indices = @transform_1, window_bounds = array<i64: 16, 156>}, {transform_indices = @transform_2, window_bounds = array<i64: 1, 1, 156>}]} {
    %c0 = arith.constant 0 : index
    %c0_0 = arith.constant 0 : index
    %0 = vector.load %arg1[%c0, %c0_0] : memref<16x156xf32, #tpu.memory_space<vmem>>, vector<16x156xf32>
    %c0_1 = arith.constant 0 : index
    %c0_2 = arith.constant 0 : index
    %1 = vector.load %arg2[%c0_1, %c0_2] : memref<16x156xf32, #tpu.memory_space<vmem>>, vector<16x156xf32>
    %2 = arith.subf %0, %1 : vector<16x156xf32>
    %3 = arith.mulf %2, %2 : vector<16x156xf32>
    %cst = arith.constant dense<0.000000e+00> : vector<156xf32>
    %4 = vector.multi_reduction <add>, %3, %cst [0] : vector<16x156xf32> to vector<156xf32>
    %5 = vector.shape_cast %4 : vector<156xf32> to vector<1x156xf32>
    %6 = vector.shape_cast %5 : vector<1x156xf32> to vector<1x1x156xf32>
    %c0_3 = arith.constant 0 : index
    %c0_4 = arith.constant 0 : index
    %c0_5 = arith.constant 0 : index
    %7 = vector.load %arg3[%c0_3, %c0_4, %c0_5] : memref<1x1x156xf32, #tpu.memory_space<vmem>>, vector<1x1x156xf32>
    tpu.vector_store %arg3[%c0_3, %c0_4, %c0_5], %6 {strides = array<i32>} : memref<1x1x156xf32, #tpu.memory_space<vmem>>, vector<1x1x156xf32>,
    return
  }
  func.func @transform_0(%arg0: i32) -> (i32, i32) {
    %c0_i32 = arith.constant 0 : i32
    %c0_i32_0 = arith.constant 0 : i32
    return %arg0, %c0_i32 : i32, i32
  }
  func.func @transform_1(%arg0: i32) -> (i32, i32) {
    %c0_i32 = arith.constant 0 : i32
    %c0_i32_0 = arith.constant 0 : i32
    return %arg0, %c0_i32 : i32, i32
  }
  func.func @transform_2(%arg0: i32) -> (i32, i32, i32) {
    %c0_i32 = arith.constant 0 : i32
    %c0_i32_0 = arith.constant 0 : i32
    %c0_i32_1 = arith.constant 0 : i32
    return %arg0, %c0_i32, %c0_i32_0 : i32, i32, i32
  }
}

</mosaic_0001>

<bundles_post_ra>
// kernel: tpu_custom_call.1
= control target key start
LH: loop header
LB: loop body
LE: loop exit
PB: predicated region body
PF: predicated region fallthrough
CT: control target
= control target key end

     0   :  { %7 = vsyncpa [#allocation3], 0  ;;  %s218_s0 = inlined_call_operand.hbm [shape: f32[16,156], index: 0, kind: input, shape index: {}]   ;;  %s219_s1 = inlined_call_operand.hbm [shape: f32[16,156], index: 1, kind: input, shape index: {}]   ;;  %s220_s2 = inlined_call_operand.hbm [shape: f32[1,1,156], index: 2, kind: output, shape index: {}]  }
   0x1   :  { %8 = vsyncpa [#allocation6], 0 }
   0x2   :  { %9 = vsyncpa [#allocation4], 0  ;;  %s14_s11 = sshll.u32 %s218_s0, 4  ;;  %s189_s12 = smov [#allocation2]   ;;  %s15_s11 = int_to_ptr.hbm [resolvable:$true] %s14_s11 }
   0x3   :  { %s16_s13 = sshll.u32 %s189_s12, 4  ;;  %s27_s16 = sshll.u32 %s219_s1, 4  ;;  %s17_s13 = int_to_ptr.vmem [resolvable:$true] %s16_s13  ;;  %s28_s16 = int_to_ptr.hbm [resolvable:$true] %s27_s16 }
   0x4   :  { %s190_s17 = smov 256   ;;  %s191_s18 = smov 16  }
   0x5   :  { %22 = dma.hbm_to_vmem [thread:$0]  %s15_s11, 512, %s17_s13, [#allocation3], %s190_s17, %s190_s17, %s191_s18  }
   0x6   :  { %s192_s19 = smov [#allocation5]  }
   0x7   :  { %s29_s20 = sshll.u32 %s192_s19, 4  ;;  %s30_s20 = int_to_ptr.vmem [resolvable:$true] %s29_s20 }
   0x8   :  { %35 = dma.hbm_to_vmem [thread:$0]  %s28_s16, 512, %s30_s20, [#allocation6], %s190_s17, %s190_s17, %s191_s18  }
   0x9   :  { %183 = dma.done.wait [#allocation3], 512  }
   0xa   :  { %184 = vsyncadd [#allocation3], 4294966784 }
   0xb   :  { %185 = dma.done.wait [#allocation6], 512  }
   0xc   :  { %186 = vsyncadd [#allocation6], 4294966784  ;;  %v44_v0 = vld [vmem:[#allocation2] sm:$0xff]  ;;  %v45_v1 = vld [vmem:[#allocation2 + $0x8] sm:$0xff]  ;;  %vm67_vm0 = vcmask 228352   ;;  %v83_v30 = vlaneseq  ;;  %s193_s0 = smov [#allocation7]  }
   0xd   :  { %v46_v2 = vld [vmem:[#allocation2 + $0x10] sm:$0xff]  ;;  %v47_v3 = vld [vmem:[#allocation2 + $0x18] sm:$0xff]  ;;  %v48_v4 = vld [vmem:[#allocation5] sm:$0xff]  ;;  %s93_s1 = sshll.u32 %s193_s0, 4  ;;  %s95_s23 = sshll.u32 %s220_s2, 4  ;;  %vm80_vm1 = vcmask 1040384   ;;  %s94_s1 = int_to_ptr.vmem [resolvable:$true] %s93_s1  ;;  %s96_s23 = int_to_ptr.hbm [resolvable:$true] %s95_s23 }
   0xe   :  { %v49_v5 = vld [vmem:[#allocation5 + $0x8] sm:$0xff]  ;;  %v50_v6 = vld [vmem:[#allocation5 + $0x10] sm:$0xff]  ;;  %v51_v7 = vld [vmem:[#allocation5 + $0x18] sm:$0xff]  ;;  %v52_v8 = vsub.f32 %v44_v0, %v48_v4  ;;  %vm85_vm2 = vcmp.lt.s32.totalorder %v83_v30, 156 }
   0xf   :  { %v53_v9 = vsub.f32 %v45_v1, %v49_v5  ;;  %v54_v10 = vsub.f32 %v46_v2, %v50_v6  ;;  %v55_v11 = vsub.f32 %v47_v3, %v51_v7 }
  0x10   :  { %v56_v12 = vmul.f32 %v52_v8, %v52_v8 }
  0x11   :  { %v57_v13 = vmul.f32 %v53_v9, %v53_v9  ;;  %v58_v14 = vmul.f32 %v54_v10, %v54_v10  ;;  %v59_v15 = vmul.f32 %v55_v11, %v55_v11 }
  0x13   :  { %v68_v16 = vsel %vm67_vm0, %v57_v13, 0.0  ;;  %v60_v17 = vadd.f32 %v58_v14, %v56_v12  ;;  %v69_v18 = vsel %vm67_vm0, %v59_v15, 0.0 }
  0x14   :  { %v70_v19 = vadd.f32 %v69_v18, %v68_v16 }
  0x15   :  { %v61_v20 = vrot.slane %v60_v17, 4 }
  0x16   :  { %v71_v21 = vrot.slane %v70_v19, 4 }
  0x17   :  { %v62_v22 = vadd.f32 %v61_v20, %v60_v17 }
  0x18   :  { %v72_v23 = vadd.f32 %v71_v21, %v70_v19 }
  0x19   :  { %v63_v24 = vrot.slane %v62_v22, 2 }
  0x1a   :  { %v73_v25 = vrot.slane %v72_v23, 2 }
  0x1b   :  { %v64_v26 = vadd.f32 %v63_v24, %v62_v22 }
  0x1c   :  { %v74_v27 = vadd.f32 %v73_v25, %v72_v23 }
  0x1d   :  { %v65_v28 = vrot.slane %v64_v26, 1 }
  0x1e   :  { %v75_v29 = vrot.slane %v74_v27, 1 }
  0x1f   :  { %v66_v31 = vadd.f32 %v65_v28, %v64_v26 }
  0x20   :  { %v76_v32 = vadd.f32 %v75_v29, %v74_v27 }
  0x22   :  { %v79_v33 = vrot.slane %v76_v32, 7 }
  0x24   :  { %v81_v34 = vsel %vm80_vm1, %v66_v31, %v79_v33 }
  0x25   :  { %87 = vst.msk [vmem:[#allocation7] sm:$0x3] %vm85_vm2, %v81_v34 }
  0x26   :  { %98 = dma.vmem_to_hbm [thread:$0]  %s94_s1, 32, %s96_s23, [#allocation4]  }
  0x27   :  { %187 = dma.done.wait [#allocation4], 32  }
  0x28   :  { %188 = vsyncadd [#allocation4], 4294967264 }
  0x29   :  { %103 = vsyncpa [#allocation3], 1 }
  0x2a   :  { %104 = vsyncpa [#allocation6], 1 }
  0x2b   :  { %105 = vsyncpa [#allocation4], 1 }

</bundles_post_ra>
